<compile_context>
chip_gen: v7x
topology: tpu7x:2x2x1
jax: 0.10.0
libtpu: 0.0.40
codegen_flags: <defaults>
</compile_context>

<pallas_src>
import jax
import jax.numpy as jnp
from jax.experimental import pallas as pl
from jax.experimental.pallas import tpu as pltpu

SEQUENCE_LENGTH = 20
H1 = 128
H2 = 64

_ROW_ALIGN = 16      # sublane alignment valid for both f32 (8) and bf16 (16) tiles
_MAX_TILE = 4096     # per-step work >> ~600-cycle grid overhead; VMEM-safe on v7x


def _cdiv(a, b):
    return -(-a // b)


def _round_up(n, m):
    return ((n + m - 1) // m) * m


def _leaky_relu(x, slope=0.2):
    return jnp.where(x > 0, x, slope * x)


def _choose_batch_tile(B, max_tile):
    """Padding-aware, two-TensorCore-aware batch tile selection.

    * n_tiles is the minimum tile count at max_tile, so row-padding waste is
      bounded by the row alignment instead of by the tile size for awkward B
      (e.g. B=560 now pads 16 rows instead of 464).
    * When the batch is large enough for two aligned tiles, force an even grid
      of length >= 2 so dimension_semantics=("parallel",) can shard the batch
      across v7x's two TensorCores (no effect on single-TC v5e/v6e).
    """
    n_tiles = _cdiv(B, max_tile)
    if B >= 2 * _ROW_ALIGN:
        n_tiles = _round_up(max(n_tiles, 2), 2)
    tb = _round_up(_cdiv(B, n_tiles), _ROW_ALIGN)
    b_pad = _round_up(B, tb)
    return tb, b_pad


def discriminator_kernel(x_ref, w1_ref, b1_ref, w2_ref, b2_ref, w3_ref, b3_ref,
                         o_ref):
    """One (TB, 20) batch tile -> (TB, 1) sigmoid scores."""
    # Layer 1: Linear(20 -> 128) + LeakyReLU.  bf16 MXU operands, f32 accum.
    # The astype is a no-op when the producer already streams bf16.
    x = x_ref[...].astype(jnp.bfloat16)                       # (TB, 20)
    h1 = jnp.dot(x, w1_ref[...], preferred_element_type=jnp.float32)
    h1 = _leaky_relu(h1 + b1_ref[...])                        # (TB, 128) f32
    # TODO(synk): if a bundle dump shows the MXU push cadence saturated, move
    # this K=20 layer onto the VPU as 20 broadcast multiply-adds.

    # Layer 2: Linear(128 -> 64) + LeakyReLU.
    h2 = jnp.dot(h1.astype(jnp.bfloat16), w2_ref[...],
                 preferred_element_type=jnp.float32)
    h2 = _leaky_relu(h2 + b2_ref[...])                        # (TB, 64) f32

    # Layer 3: Linear(64 -> 1) + Sigmoid.  VPU multiply + XLU lane reduction
    # instead of an N=1 MXU matmul.
    z = jnp.sum(h2 * w3_ref[...], axis=-1, keepdims=True) + b3_ref[0, 0]
    o_ref[...] = jax.nn.sigmoid(z)                            # (TB, 1) f32


def discriminator_forward(x, params, *, max_tile=_MAX_TILE):
    """x: (B, 20) float array (f32 or bf16) -> (B, 1) float32 sigmoid scores."""
    w1, b1, w2, b2, w3, b3 = params
    B = x.shape[0]

    tb, b_pad = _choose_batch_tile(B, max_tile)
    if b_pad != B:
        x = jnp.pad(x, ((0, b_pad - B), (0, 0)))

    # MXU operands in bf16 (accumulation stays f32 in-kernel); the rest f32.
    w1b = w1.astype(jnp.bfloat16)                  # (20, 128)
    w2b = w2.astype(jnp.bfloat16)                  # (128, 64)
    b1r = b1.reshape(1, H1).astype(jnp.float32)
    b2r = b2.reshape(1, H2).astype(jnp.float32)
    w3r = w3.reshape(1, H2).astype(jnp.float32)    # row vector for VPU layer 3
    b3r = b3.reshape(1, 1).astype(jnp.float32)     # SMEM scalar

    grid = (b_pad // tb,)
    const = lambda shape: pl.BlockSpec(shape, lambda i: (0, 0))  # resident block

    out = pl.pallas_call(
        discriminator_kernel,
        out_shape=jax.ShapeDtypeStruct((b_pad, 1), jnp.float32),
        grid_spec=pltpu.PrefetchScalarGridSpec(
            num_scalar_prefetch=0,
            grid=grid,
            in_specs=[
                pl.BlockSpec((tb, SEQUENCE_LENGTH), lambda i: (i, 0)),  # x tile
                const((SEQUENCE_LENGTH, H1)),                           # w1
                const((1, H1)),                                         # b1
                const((H1, H2)),                                        # w2
                const((1, H2)),                                         # b2
                const((1, H2)),                                         # w3 row
                pl.BlockSpec((1, 1), lambda i: (0, 0),
                             memory_space=pltpu.MemorySpace.SMEM),      # b3
            ],
            # TODO(synk): if xprof ever shows exposed output writeback, switch
            # to a lane-dense (grid, tb) out_shape with an in-kernel transpose.
            out_specs=pl.BlockSpec((tb, 1), lambda i: (i, 0)),
        ),
        compiler_params=pltpu.CompilerParams(
            dimension_semantics=("parallel",),   # shard batch across TCs on v7x
            vmem_limit_bytes=32 * 1024 * 1024,   # raise over v5e's 16 MiB default
        ),
    )(x, w1b, b1r, w2b, b2r, w3r, b3r)
    return out[:B]


def init_params(key):
    """Deterministic parameter init (PyTorch-Linear-like uniform ranges)."""
    ks = jax.random.split(key, 6)

    def lin(kw, kb, fan_in, fan_out):
        bound = 1.0 / jnp.sqrt(float(fan_in))
        w = jax.random.uniform(kw, (fan_in, fan_out), jnp.float32,
                               -bound, bound)
        b = jax.random.uniform(kb, (1, fan_out), jnp.float32, -bound, bound)
        return w, b

    w1, b1 = lin(ks[0], ks[1], SEQUENCE_LENGTH, H1)
    w2, b2 = lin(ks[2], ks[3], H1, H2)
    w3, b3 = lin(ks[4], ks[5], H2, 1)
    return (w1, b1, w2, b2, w3, b3)


def reference_forward(x, params):
    """Pure-JAX f32 reference matching the PyTorch module semantics."""
    w1, b1, w2, b2, w3, b3 = params
    x = x.astype(jnp.float32)
    h1 = _leaky_relu(x @ w1 + b1)
    h2 = _leaky_relu(h1 @ w2 + b2)
    return jax.nn.sigmoid(h2 @ w3 + b3)


if __name__ == "__main__":
    key = jax.random.PRNGKey(0)
    k_param, k_x1, k_x2 = jax.random.split(key, 3)

    params = init_params(k_param)

    # Small batch (matches the original training-script usage), f32 input.
    x_small = jax.random.normal(k_x1, (8, SEQUENCE_LENGTH), jnp.float32)
    out_small = jax.block_until_ready(discriminator_forward(x_small, params))
    ref_small = reference_forward(x_small, params)
    assert out_small.shape == (8, 1)
    assert jnp.allclose(out_small, ref_small, atol=1e-2), \
        float(jnp.max(jnp.abs(out_small - ref_small)))

    # Larger, awkward batch: exercises the padding-aware 2-tile grid and the
    # bf16-streamed x path (producer emits bf16; no extra wrapper cast pass).
    x_big = jax.random.normal(
        k_x2, (560, SEQUENCE_LENGTH), jnp.float32).astype(jnp.bfloat16)
    out_big = jax.block_until_ready(discriminator_forward(x_big, params))
    ref_big = reference_forward(x_big, params)
    assert out_big.shape == (560, 1)
    assert jnp.allclose(out_big, ref_big, atol=1e-2), \
        float(jnp.max(jnp.abs(out_big - ref_big)))

    print("KERNEL_OK")
</pallas_src>

<mosaic_0001>
module attributes {stable_mosaic.version = 11 : i64} {
  func.func @discriminator_kernel(%arg0: i32, %arg1: memref<16x20xf32, #tpu.memory_space<vmem>>, %arg2: memref<20x128xbf16, #tpu.memory_space<vmem>>, %arg3: memref<1x128xf32, #tpu.memory_space<vmem>>, %arg4: memref<128x64xbf16, #tpu.memory_space<vmem>>, %arg5: memref<1x64xf32, #tpu.memory_space<vmem>>, %arg6: memref<1x64xf32, #tpu.memory_space<vmem>>, %arg7: memref<1x1xf32, #tpu.memory_space<smem>>, %arg8: memref<16x1xf32, #tpu.memory_space<vmem>>) attributes {dimension_semantics = [#tpu.dimension_semantics<parallel>], iteration_bounds = array<i64: 1>, scalar_prefetch = 0 : i64, scratch_operands = 0 : i64, tpu.core_type = #tpu.core_type<tc>, window_params = [{transform_indices = @transform_0, window_bounds = array<i64: 16, 20>}, {pipeline_mode = #tpu.pipeline_mode<synchronous>, transform_indices = @transform_1, window_bounds = array<i64: 20, 128>}, {pipeline_mode = #tpu.pipeline_mode<synchronous>, transform_indices = @transform_2, window_bounds = array<i64: 1, 128>}, {pipeline_mode = #tpu.pipeline_mode<synchronous>, transform_indices = @transform_3, window_bounds = array<i64: 128, 64>}, {pipeline_mode = #tpu.pipeline_mode<synchronous>, transform_indices = @transform_4, window_bounds = array<i64: 1, 64>}, {pipeline_mode = #tpu.pipeline_mode<synchronous>, transform_indices = @transform_5, window_bounds = array<i64: 1, 64>}, {transform_indices = @transform_6, window_bounds = array<i64: 1, 1>}, {transform_indices = @transform_7, window_bounds = array<i64: 16, 1>}]} {
    %c0 = arith.constant 0 : index
    %c0_0 = arith.constant 0 : index
    %0 = vector.load %arg1[%c0, %c0_0] : memref<16x20xf32, #tpu.memory_space<vmem>>, vector<16x20xf32>
    %1 = arith.truncf %0 : vector<16x20xf32> to vector<16x20xbf16>
    %c0_1 = arith.constant 0 : index
    %c0_2 = arith.constant 0 : index
    %2 = vector.load %arg2[%c0_1, %c0_2] : memref<20x128xbf16, #tpu.memory_space<vmem>>, vector<20x128xbf16>
    %cst = arith.constant dense<0.000000e+00> : vector<16x128xf32>
    %3 = tpu.matmul %1, %2, %cst {dimension_numbers = #tpu.dot_dimension_numbers<[1], [0], [0], [1], [0, 0, 1, 1], [], []>} : vector<16x20xbf16>, vector<20x128xbf16>, vector<16x128xf32> -> vector<16x128xf32>
    %c0_3 = arith.constant 0 : index
    %c0_4 = arith.constant 0 : index
    %4 = vector.load %arg3[%c0_3, %c0_4] : memref<1x128xf32, #tpu.memory_space<vmem>>, vector<1x128xf32>
    %5 = vector.broadcast %4 : vector<1x128xf32> to vector<16x128xf32>
    %6 = arith.addf %3, %5 : vector<16x128xf32>
    %cst_5 = arith.constant 0.000000e+00 : f32
    %7 = vector.broadcast %cst_5 : f32 to vector<16x128xf32>
    %8 = arith.cmpf ogt, %6, %7 : vector<16x128xf32>
    %cst_6 = arith.constant 2.000000e-01 : f32
    %9 = vector.broadcast %cst_6 : f32 to vector<16x128xf32>
    %10 = arith.mulf %9, %6 : vector<16x128xf32>
    %11 = arith.select %8, %6, %10 : vector<16x128xi1>, vector<16x128xf32>
    %12 = arith.truncf %11 : vector<16x128xf32> to vector<16x128xbf16>
    %c0_7 = arith.constant 0 : index
    %c0_8 = arith.constant 0 : index
    %13 = vector.load %arg4[%c0_7, %c0_8] : memref<128x64xbf16, #tpu.memory_space<vmem>>, vector<128x64xbf16>
    %cst_9 = arith.constant dense<0.000000e+00> : vector<16x64xf32>
    %14 = tpu.matmul %12, %13, %cst_9 {dimension_numbers = #tpu.dot_dimension_numbers<[1], [0], [0], [1], [0, 0, 1, 1], [], []>} : vector<16x128xbf16>, vector<128x64xbf16>, vector<16x64xf32> -> vector<16x64xf32>
    %c0_10 = arith.constant 0 : index
    %c0_11 = arith.constant 0 : index
    %15 = vector.load %arg5[%c0_10, %c0_11] : memref<1x64xf32, #tpu.memory_space<vmem>>, vector<1x64xf32>
    %16 = vector.broadcast %15 : vector<1x64xf32> to vector<16x64xf32>
    %17 = arith.addf %14, %16 : vector<16x64xf32>
    %cst_12 = arith.constant 0.000000e+00 : f32
    %18 = vector.broadcast %cst_12 : f32 to vector<16x64xf32>
    %19 = arith.cmpf ogt, %17, %18 : vector<16x64xf32>
    %cst_13 = arith.constant 2.000000e-01 : f32
    %20 = vector.broadcast %cst_13 : f32 to vector<16x64xf32>
    %21 = arith.mulf %20, %17 : vector<16x64xf32>
    %22 = arith.select %19, %17, %21 : vector<16x64xi1>, vector<16x64xf32>
    %c0_14 = arith.constant 0 : index
    %c0_15 = arith.constant 0 : index
    %23 = vector.load %arg6[%c0_14, %c0_15] : memref<1x64xf32, #tpu.memory_space<vmem>>, vector<1x64xf32>
    %24 = vector.broadcast %23 : vector<1x64xf32> to vector<16x64xf32>
    %25 = arith.mulf %22, %24 : vector<16x64xf32>
    %cst_16 = arith.constant dense<0.000000e+00> : vector<16xf32>
    %26 = vector.multi_reduction <add>, %25, %cst_16 [1] : vector<16x64xf32> to vector<16xf32>
    %27 = vector.shape_cast %26 : vector<16xf32> to vector<16x1xf32>
    %c0_17 = arith.constant 0 : index
    %c0_18 = arith.constant 0 : index
    %28 = memref.load %arg7[%c0_17, %c0_18] : memref<1x1xf32, #tpu.memory_space<smem>>
    %29 = vector.broadcast %28 : f32 to vector<16x1xf32>
    %30 = arith.addf %27, %29 : vector<16x1xf32>
    %31 = arith.negf %30 : vector<16x1xf32>
    %32 = math.exp %31 : vector<16x1xf32>
    %cst_19 = arith.constant 1.000000e+00 : f32
    %33 = vector.broadcast %cst_19 : f32 to vector<16x1xf32>
    %34 = arith.addf %33, %32 : vector<16x1xf32>
    %35 = arith.divf %33, %34 : vector<16x1xf32>
    %c0_20 = arith.constant 0 : index
    %c0_21 = arith.constant 0 : index
    %36 = vector.load %arg8[%c0_20, %c0_21] : memref<16x1xf32, #tpu.memory_space<vmem>>, vector<16x1xf32>
    tpu.vector_store %arg8[%c0_20, %c0_21], %35 {strides = array<i32>} : memref<16x1xf32, #tpu.memory_space<vmem>>, vector<16x1xf32>,
    return
  }
  func.func @transform_0(%arg0: i32) -> (i32, i32) {
    %c0_i32 = arith.constant 0 : i32
    %c0_i32_0 = arith.constant 0 : i32
    return %arg0, %c0_i32 : i32, i32
  }
  func.func @transform_1(%arg0: i32) -> (i32, i32) {
    %c0_i32 = arith.constant 0 : i32
    %c0_i32_0 = arith.constant 0 : i32
    %c0_i32_1 = arith.constant 0 : i32
    return %c0_i32, %c0_i32_0 : i32, i32
  }
  func.func @transform_2(%arg0: i32) -> (i32, i32) {
    %c0_i32 = arith.constant 0 : i32
    %c0_i32_0 = arith.constant 0 : i32
    %c0_i32_1 = arith.constant 0 : i32
    return %c0_i32, %c0_i32_0 : i32, i32
  }
  func.func @transform_3(%arg0: i32) -> (i32, i32) {
    %c0_i32 = arith.constant 0 : i32
    %c0_i32_0 = arith.constant 0 : i32
    %c0_i32_1 = arith.constant 0 : i32
    return %c0_i32, %c0_i32_0 : i32, i32
  }
  func.func @transform_4(%arg0: i32) -> (i32, i32) {
    %c0_i32 = arith.constant 0 : i32
    %c0_i32_0 = arith.constant 0 : i32
    %c0_i32_1 = arith.constant 0 : i32
    return %c0_i32, %c0_i32_0 : i32, i32
  }
  func.func @transform_5(%arg0: i32) -> (i32, i32) {
    %c0_i32 = arith.constant 0 : i32
    %c0_i32_0 = arith.constant 0 : i32
    %c0_i32_1 = arith.constant 0 : i32
    return %c0_i32, %c0_i32_0 : i32, i32
  }
  func.func @transform_6(%arg0: i32) -> (i32, i32) {
    %c0_i32 = arith.constant 0 : i32
    %c0_i32_0 = arith.constant 0 : i32
    %c0_i32_1 = arith.constant 0 : i32
    return %c0_i32, %c0_i32_0 : i32, i32
  }
  func.func @transform_7(%arg0: i32) -> (i32, i32) {
    %c0_i32 = arith.constant 0 : i32
    %c0_i32_0 = arith.constant 0 : i32
    return %arg0, %c0_i32 : i32, i32
  }
}

</mosaic_0001>

<bundles_post_ra>
// kernel: tpu_custom_call.1
= control target key start
LH: loop header
LB: loop body
LE: loop exit
PB: predicated region body
PF: predicated region fallthrough
CT: control target
= control target key end

     0   :  { %v339_v0 = vmov 0.0   ;;  %vm54_vm0 = vcmask 1041408   ;;  %vm340_vm1 = vmmov 0   ;;  %vm50_vm2 = vcmask 162816   ;;  %s435_s1 = inlined_call_operand.vmem [shape: bf16[20,128], index: 1, kind: input, shape index: {}]   ;;  %s436_s0 = inlined_call_operand.vmem [shape: f32[16,20], index: 0, kind: input, shape index: {}]   ;;  %s437_s3 = inlined_call_operand.vmem [shape: bf16[128,64], index: 3, kind: input, shape index: {}]   ;;  %s438_s2 = inlined_call_operand.vmem [shape: f32[1,128], index: 2, kind: input, shape index: {}]   ;;  %s439_s4 = inlined_call_operand.vmem [shape: f32[1,64], index: 4, kind: input, shape index: {}]   ;;  %s440_s5 = inlined_call_operand.vmem [shape: f32[1,64], index: 5, kind: input, shape index: {}]   ;;  %s441_s6 = inlined_call_operand.<no memory space> [shape: f32[1,1], index: 6, kind: input, shape index: {}]   ;;  %s442_s7 = inlined_call_operand.vmem [shape: f32[16,1], index: 7, kind: output, shape index: {}]  }
   0x1   :  { %291 = vmatprep.subr.bf16.mxu0 %v339_v0  ;;  %v321_v1 = vld [vmem:[%s435_s1] sm:$0xff]   ;;  %295 = vmatprep.mubr.msk.bf16.mxu0 %vm340_vm1, %v339_v0  ;;  %v322_v2 = vld [vmem:[%s435_s1 + $0x8] ss:$0 sps:$4 sm:$0x33]   ;;  %v325_v9 = vld [vmem:[%s437_s3 + $0x10] sm:$0xff]   ;;  %vm233_vm7 = vcmask 523264   ;;  %v241_v43 = vstv %s441_s6 }
   0x2   :  { %v28_v3 = vld [vmem:[%s436_s0] sm:$0xff]  ;;  %299 = vmatprep.subr.bf16.mxu1 %v339_v0  ;;  %315 = vmatprep.mubr.msk.bf16.mxu1 %vm340_vm1, %v339_v0  ;;  %v29_v4 = vld [vmem:[%s436_s0 + $0x8] sm:$0xff]  ;;  %v56_v5 = vsel %vm54_vm0, %v322_v2, 0  ;;  %v326_v10 = vld [vmem:[%s437_s3 + $0x18] sm:$0xff]   ;;  %vm256_vm8 = vcmask 7168  }
   0x3   :  { %292 = vmatpush3.bf16.msra.mxu0 %v321_v1  ;;  %v323_v6 = vld [vmem:[%s437_s3] sm:$0xff]   ;;  %v30_v7 = vpack.c.bf16 %v29_v4, %v28_v3  ;;  %v324_v8 = vld [vmem:[%s437_s3 + $0x8] sm:$0xff]   ;;  %v329_v13 = vld [vmem:[%s437_s3 + $0x30] sm:$0xff]  }
   0x4   :  { %293 = vmatprep.subr.bf16.mxu0 %v339_v0  ;;  %300 = vmatpush3.bf16.msra.mxu1 %v323_v6  ;;  %v327_v11 = vld [vmem:[%s437_s3 + $0x20] sm:$0xff]   ;;  %v328_v12 = vld [vmem:[%s437_s3 + $0x28] sm:$0xff]   ;;  %v330_v14 = vld [vmem:[%s437_s3 + $0x38] sm:$0xff]  }
   0x5   :  { %301 = vmatprep.subr.bf16.mxu1 %v339_v0  ;;  %v263_v15 = vld [vmem:[%s438_s2] ss:$0 sm:$0xff] }
   0x6   :  { %v267_v27 = vld [vmem:[%s439_s4] ss:$0 sm:$0xff] }
   0x7   :  { %294 = vmatpush3.bf16.msra.mxu0 %v56_v5  ;;  %v276_v35 = vld [vmem:[%s440_s5] ss:$0 sm:$0xff] }
   0x8   :  { %302 = vmatpush3.bf16.msra.mxu1 %v324_v8 }
   0x9   :  { %303 = vmatprep.subr.bf16.mxu1 %v339_v0 }
   0xa   :  { %296 = vmatmul.mubr.msk.bf16.vlgmr.msra.gmra.mrb[0].mxu0 %vm50_vm2, %v30_v7 }
   0xc   :  { %304 = vmatpush3.bf16.msra.mxu1 %v325_v9 }
   0xd   :  { %305 = vmatprep.subr.bf16.mxu1 %v339_v0 }
  0x10   :  { %306 = vmatpush3.bf16.msra.mxu1 %v326_v10 }
  0x11   :  { %307 = vmatprep.subr.bf16.mxu1 %v339_v0 }
  0x14   :  { %308 = vmatpush3.bf16.msra.mxu1 %v327_v11 }
  0x15   :  { %309 = vmatprep.subr.bf16.mxu1 %v339_v0 }
  0x18   :  { %310 = vmatpush3.bf16.msra.mxu1 %v328_v12 }
  0x19   :  { %311 = vmatprep.subr.bf16.mxu1 %v339_v0 }
  0x1c   :  { %312 = vmatpush3.bf16.msra.mxu1 %v329_v13 }
  0x1d   :  { %313 = vmatprep.subr.bf16.mxu1 %v339_v0 }
  0x20   :  { %314 = vmatpush3.bf16.msra.mxu1 %v330_v14 }
  0xdd   :  { %v92_v16 = vpop.f32.mrb[0].mxu0 }
  0xde   :  { %v93_v17 = vadd.f32 %v263_v15, %v92_v16  ;;  %v297_v18 = vpop.f32.mrb[1].mxu0 }
  0xdf   :  { %v95_v19 = vpop.f32.mrb[2].mxu0 }
  0xe0   :  { %v101_v20 = vmul.f32 0.2, %v93_v17  ;;  %v96_v21 = vadd.f32 %v263_v15, %v95_v19  ;;  %v298_v22 = vpop.f32.mrb[3].mxu0  ;;  %vm99_vm3 = vcmp.gt.f32.partialorder %v93_v17, 0.0 }
  0xe2   :  { %vm100_vm4 = vcmp.gt.f32.partialorder %v96_v21, 0.0  ;;  %v102_v23 = vmul.f32 0.2, %v96_v21  ;;  %v103_v24 = vsel %vm99_vm3, %v93_v17, %v101_v20 }
  0xe4   :  { %v104_v25 = vsel %vm100_vm4, %v96_v21, %v102_v23 }
  0xe5   :  { %v105_v26 = vpack.c.bf16 %v104_v25, %v103_v24 }
  0xe7   :  { %316 = vmatmul.mubr.bf16.vlgmr.msra.gmra.mrb[0].mxu1 %v105_v26 }
 0x1ba   :  { %v211_v28 = vpop.f32.mrb[0].mxu1 }
 0x1bb   :  { %v212_v29 = vadd.f32 %v267_v27, %v211_v28  ;;  %v317_v30 = vpop.f32.mrb[1].mxu1 }
 0x1bc   :  { %v214_v31 = vpop.f32.mrb[2].mxu1 }
 0x1bd   :  { %v220_v32 = vmul.f32 0.2, %v212_v29  ;;  %v215_v33 = vadd.f32 %v267_v27, %v214_v31  ;;  %v318_v34 = vpop.f32.mrb[3].mxu1  ;;  %vm218_vm5 = vcmp.gt.f32.partialorder %v212_v29, 0.0 }
 0x1bf   :  { %vm219_vm6 = vcmp.gt.f32.partialorder %v215_v33, 0.0  ;;  %v221_v36 = vmul.f32 0.2, %v215_v33  ;;  %v222_v37 = vsel %vm218_vm5, %v212_v29, %v220_v32 }
 0x1c0   :  { %v231_v38 = vmul.f32 %v276_v35, %v222_v37 }
 0x1c1   :  { %v223_v39 = vsel %vm219_vm6, %v215_v33, %v221_v36 }
 0x1c2   :  { %v234_v40 = vsel %vm233_vm7, %v231_v38, 0.0  ;;  %v232_v41 = vmul.f32 %v276_v35, %v223_v39 }
 0x1c3   :  { %235 = vadd.xlane.f32.xlu0 %v234_v40 }
 0x1c4   :  { %v237_v42 = vsel %vm233_vm7, %v232_v41, 0.0 }
 0x1c7   :  { %238 = vadd.xlane.f32.xlu0 %v237_v42 }
 0x250   :  { %v236_v44 = vpop.xlane.xlu0 %235 }
 0x251   :  { %v242_v45 = vadd.f32 %v241_v43, %v236_v44 }
 0x253   :  { %v277_v46 = vmul.f32 -1.442695, %v242_v45 }
 0x254   :  { %v239_v47 = vpop.xlane.xlu0 %238 }
 0x255   :  { %331 = vpow2.f32 %v277_v46  ;;  %v243_v48 = vadd.f32 %v241_v43, %v239_v47 }
 0x257   :  { %v278_v49 = vmul.f32 -1.442695, %v243_v48 }
 0x259   :  { %333 = vpow2.f32 %v278_v49 }
 0x25f   :  { %v332_v50 = vpop.eup %331 }
 0x260   :  { %v250_v51 = vadd.f32 1.0, %v332_v50 }
 0x262   :  { %335 = vrcp.f32 %v250_v51 }
 0x263   :  { %v334_v52 = vpop.eup %333 }
 0x264   :  { %v251_v53 = vadd.f32 1.0, %v334_v52 }
 0x266   :  { %337 = vrcp.f32 %v251_v53 }
 0x26c   :  { %v336_v54 = vpop.eup %335 }
 0x26d   :  { %257 = vst.msk [vmem:[%s442_s7] sm:$0xff] %vm256_vm8, %v336_v54 }
 0x270   :  { %v338_v55 = vpop.eup %337 }
 0x271   :  { %258 = vst.msk [vmem:[%s442_s7 + $0x8] sm:$0xff] %vm256_vm8, %v338_v55 }

</bundles_post_ra>
